<compile_context>
chip_gen: v5e
topology: v5e:2x2
jax: 0.10.0
libtpu: 0.0.40
codegen_flags: <defaults>
</compile_context>

<pallas_src>
import functools

import jax
import jax.numpy as jnp
import numpy as np
from jax.experimental import pallas as pl
from jax.experimental.pallas import tpu as pltpu

LANE = 128  # TPU lane width; fc3 output is padded up to a multiple of this.


def actor_kernel(x_ref, w1_ref, gamma_ref, beta_ref,
                 w2_ref, b2_ref, w3_ref, b3_ref, o_ref):
    eps = 1e-5
    x = x_ref[...].astype(jnp.float32)
    w1 = w1_ref[...].astype(jnp.float32)   # bf16 in HBM/VMEM -> f32 math
    w2 = w2_ref[...].astype(jnp.float32)
    w3 = w3_ref[...].astype(jnp.float32)

    # --- fc1 (bias omitted: exactly cancelled by training-mode BN) ---
    h1 = jnp.dot(x, w1, preferred_element_type=jnp.float32)

    # --- BatchNorm1d (batch stats, biased var) folded into scale/shift ---
    mean = jnp.mean(h1, axis=0, keepdims=True)
    diff = h1 - mean
    var = jnp.mean(diff * diff, axis=0, keepdims=True)
    scale = gamma_ref[...] * jax.lax.rsqrt(var + eps)       # EUP rsqrt
    shift = beta_ref[...] - scale * mean
    h = jnp.maximum(scale * h1 + shift, 0.0)                # BN + relu

    # --- fc2 + relu ---
    h2 = jnp.dot(h, w2, preferred_element_type=jnp.float32) + b2_ref[...]
    h2 = jnp.maximum(h2, 0.0)

    # --- fc3 (padded to 128 lanes) + tanh; lane-dense unmasked store ---
    out = jnp.dot(h2, w3, preferred_element_type=jnp.float32) + b3_ref[...]
    o_ref[...] = jnp.tanh(out).astype(o_ref.dtype)


@functools.partial(jax.jit, static_argnames=("action_size",))
def actor_forward(state, params, action_size):
    (w1, b1, gamma, beta, w2, b2, w3p, b3p) = params
    del b1  # fc1 bias cancels under training-mode BatchNorm; not DMA'd.
    B = state.shape[0]
    a_pad = w3p.shape[1]

    inputs = (state, w1, gamma, beta, w2, b2, w3p, b3p)
    bytes_accessed = sum(int(np.prod(a.shape)) * a.dtype.itemsize for a in inputs)
    bytes_accessed += B * a_pad * 4
    flops = 2 * B * (w1.shape[0] * w1.shape[1]
                     + w2.shape[0] * w2.shape[1]
                     + w3p.shape[0] * w3p.shape[1])
    cost = pl.CostEstimate(flops=flops,
                           transcendentals=B * a_pad + w1.shape[1],
                           bytes_accessed=bytes_accessed)

    vmem = pl.BlockSpec(memory_space=pltpu.MemorySpace.VMEM)
    out_padded = pl.pallas_call(
        actor_kernel,
        out_shape=jax.ShapeDtypeStruct((B, a_pad), jnp.float32),
        in_specs=[vmem] * len(inputs),
        out_specs=vmem,
        cost_estimate=cost,
    )(*inputs)
    return out_padded[:, :action_size]


def make_params(key, state_size, action_size, fc1_units=256, fc2_units=256):
    """Parameter init mimicking Actor.reset_parameters() (+ default bias init).

    Weights are stored transposed ([in, out]) and in bf16 (halves weight DMA);
    fc3 weight/bias are zero-padded to a lane-dense width (multiple of 128).
    """
    ks = jax.random.split(key, 8)
    lim1 = 1.0 / np.sqrt(state_size)
    lim2 = 1.0 / np.sqrt(fc1_units)
    a_pad = ((action_size + LANE - 1) // LANE) * LANE

    w1 = jax.random.uniform(ks[0], (state_size, fc1_units), jnp.float32, -lim1, lim1)
    b1 = jax.random.uniform(ks[1], (1, fc1_units), jnp.float32, -lim1, lim1)
    gamma = jnp.ones((1, fc1_units), jnp.float32)     # BatchNorm1d affine init
    beta = jnp.zeros((1, fc1_units), jnp.float32)
    w2 = jax.random.uniform(ks[2], (fc1_units, fc2_units), jnp.float32, -lim2, lim2)
    b2 = jax.random.uniform(ks[3], (1, fc2_units), jnp.float32, -lim2, lim2)
    w3 = jax.random.uniform(ks[4], (fc2_units, action_size), jnp.float32, -3e-3, 3e-3)
    b3 = jax.random.uniform(ks[5], (1, action_size), jnp.float32, -3e-3, 3e-3)

    # Pad fc3 to lane-dense width (zero columns -> tanh(0)=0, sliced off later).
    w3p = jnp.zeros((fc2_units, a_pad), jnp.float32).at[:, :action_size].set(w3)
    b3p = jnp.zeros((1, a_pad), jnp.float32).at[:, :action_size].set(b3)

    return (w1.astype(jnp.bfloat16), b1, gamma, beta,
            w2.astype(jnp.bfloat16), b2,
            w3p.astype(jnp.bfloat16), b3p)


def actor_forward_ref(state, params, action_size):
    """Pure-JAX reference (PyTorch-faithful, incl. fc1 bias) on the same weights."""
    (w1, b1, gamma, beta, w2, b2, w3p, b3p) = params
    eps = 1e-5
    w1 = w1.astype(jnp.float32)
    w2 = w2.astype(jnp.float32)
    w3 = w3p.astype(jnp.float32)[:, :action_size]
    b3 = b3p[:, :action_size]
    h1 = state @ w1 + b1
    mean = jnp.mean(h1, axis=0, keepdims=True)
    var = jnp.mean((h1 - mean) ** 2, axis=0, keepdims=True)
    h = jnp.maximum(gamma * (h1 - mean) / jnp.sqrt(var + eps) + beta, 0.0)
    h2 = jnp.maximum(h @ w2 + b2, 0.0)
    return jnp.tanh(h2 @ w3 + b3)


if __name__ == "__main__":
    key = jax.random.PRNGKey(0)
    k_state, k_params = jax.random.split(key)

    batch = 8
    state_size = 32
    action_size = 4

    state = jax.random.normal(k_state, (batch, state_size), jnp.float32)
    params = make_params(k_params, state_size, action_size)

    out = actor_forward(state, params, action_size)
    jax.block_until_ready(out)
    assert out.shape == (batch, action_size)

    ref = actor_forward_ref(state, params, action_size)
    np.testing.assert_allclose(np.asarray(out), np.asarray(ref),
                               atol=3e-5, rtol=3e-5)

    print("KERNEL_OK")
</pallas_src>

<mosaic_0001>
module attributes {stable_mosaic.version = 11 : i64} {
  func.func @actor_kernel(%arg0: memref<8x32xf32, #tpu.memory_space<vmem>>, %arg1: memref<32x256xbf16, #tpu.memory_space<vmem>>, %arg2: memref<1x256xf32, #tpu.memory_space<vmem>>, %arg3: memref<1x256xf32, #tpu.memory_space<vmem>>, %arg4: memref<256x256xbf16, #tpu.memory_space<vmem>>, %arg5: memref<1x256xf32, #tpu.memory_space<vmem>>, %arg6: memref<256x128xbf16, #tpu.memory_space<vmem>>, %arg7: memref<1x128xf32, #tpu.memory_space<vmem>>, %arg8: memref<8x128xf32, #tpu.memory_space<vmem>>) attributes {dimension_semantics = [], scalar_prefetch = 0 : i64, scratch_operands = 0 : i64, tpu.core_type = #tpu.core_type<tc>} {
    %c0 = arith.constant 0 : index
    %c0_0 = arith.constant 0 : index
    %0 = vector.load %arg0[%c0, %c0_0] : memref<8x32xf32, #tpu.memory_space<vmem>>, vector<8x32xf32>
    %c0_1 = arith.constant 0 : index
    %c0_2 = arith.constant 0 : index
    %1 = vector.load %arg1[%c0_1, %c0_2] : memref<32x256xbf16, #tpu.memory_space<vmem>>, vector<32x256xbf16>
    %2 = arith.extf %1 : vector<32x256xbf16> to vector<32x256xf32>
    %c0_3 = arith.constant 0 : index
    %c0_4 = arith.constant 0 : index
    %3 = vector.load %arg4[%c0_3, %c0_4] : memref<256x256xbf16, #tpu.memory_space<vmem>>, vector<256x256xbf16>
    %4 = arith.extf %3 : vector<256x256xbf16> to vector<256x256xf32>
    %c0_5 = arith.constant 0 : index
    %c0_6 = arith.constant 0 : index
    %5 = vector.load %arg6[%c0_5, %c0_6] : memref<256x128xbf16, #tpu.memory_space<vmem>>, vector<256x128xbf16>
    %6 = arith.extf %5 : vector<256x128xbf16> to vector<256x128xf32>
    %cst = arith.constant dense<0.000000e+00> : vector<8x256xf32>
    %7 = tpu.matmul %0, %2, %cst {dimension_numbers = #tpu.dot_dimension_numbers<[1], [0], [0], [1], [0, 0, 1, 1], [], []>} : vector<8x32xf32>, vector<32x256xf32>, vector<8x256xf32> -> vector<8x256xf32>
    %cst_7 = arith.constant dense<0.000000e+00> : vector<256xf32>
    %8 = vector.multi_reduction <add>, %7, %cst_7 [0] : vector<8x256xf32> to vector<256xf32>
    %9 = vector.shape_cast %8 : vector<256xf32> to vector<1x256xf32>
    %cst_8 = arith.constant 8.000000e+00 : f32
    %10 = vector.broadcast %cst_8 : f32 to vector<1x256xf32>
    %11 = arith.divf %9, %10 : vector<1x256xf32>
    %12 = vector.broadcast %11 : vector<1x256xf32> to vector<8x256xf32>
    %13 = arith.subf %7, %12 : vector<8x256xf32>
    %14 = arith.mulf %13, %13 : vector<8x256xf32>
    %cst_9 = arith.constant dense<0.000000e+00> : vector<256xf32>
    %15 = vector.multi_reduction <add>, %14, %cst_9 [0] : vector<8x256xf32> to vector<256xf32>
    %16 = vector.shape_cast %15 : vector<256xf32> to vector<1x256xf32>
    %cst_10 = arith.constant 8.000000e+00 : f32
    %17 = vector.broadcast %cst_10 : f32 to vector<1x256xf32>
    %18 = arith.divf %16, %17 : vector<1x256xf32>
    %c0_11 = arith.constant 0 : index
    %c0_12 = arith.constant 0 : index
    %19 = vector.load %arg2[%c0_11, %c0_12] : memref<1x256xf32, #tpu.memory_space<vmem>>, vector<1x256xf32>
    %cst_13 = arith.constant 9.99999974E-6 : f32
    %20 = vector.broadcast %cst_13 : f32 to vector<1x256xf32>
    %21 = arith.addf %18, %20 : vector<1x256xf32>
    %22 = math.rsqrt %21 : vector<1x256xf32>
    %23 = arith.mulf %19, %22 : vector<1x256xf32>
    %c0_14 = arith.constant 0 : index
    %c0_15 = arith.constant 0 : index
    %24 = vector.load %arg3[%c0_14, %c0_15] : memref<1x256xf32, #tpu.memory_space<vmem>>, vector<1x256xf32>
    %25 = arith.mulf %23, %11 : vector<1x256xf32>
    %26 = arith.subf %24, %25 : vector<1x256xf32>
    %27 = vector.broadcast %23 : vector<1x256xf32> to vector<8x256xf32>
    %28 = arith.mulf %27, %7 : vector<8x256xf32>
    %29 = vector.broadcast %26 : vector<1x256xf32> to vector<8x256xf32>
    %30 = arith.addf %28, %29 : vector<8x256xf32>
    %cst_16 = arith.constant 0.000000e+00 : f32
    %31 = vector.broadcast %cst_16 : f32 to vector<8x256xf32>
    %32 = arith.maximumf %30, %31 : vector<8x256xf32>
    %cst_17 = arith.constant dense<0.000000e+00> : vector<8x256xf32>
    %33 = tpu.matmul %32, %4, %cst_17 {dimension_numbers = #tpu.dot_dimension_numbers<[1], [0], [0], [1], [0, 0, 1, 1], [], []>} : vector<8x256xf32>, vector<256x256xf32>, vector<8x256xf32> -> vector<8x256xf32>
    %c0_18 = arith.constant 0 : index
    %c0_19 = arith.constant 0 : index
    %34 = vector.load %arg5[%c0_18, %c0_19] : memref<1x256xf32, #tpu.memory_space<vmem>>, vector<1x256xf32>
    %35 = vector.broadcast %34 : vector<1x256xf32> to vector<8x256xf32>
    %36 = arith.addf %33, %35 : vector<8x256xf32>
    %cst_20 = arith.constant 0.000000e+00 : f32
    %37 = vector.broadcast %cst_20 : f32 to vector<8x256xf32>
    %38 = arith.maximumf %36, %37 : vector<8x256xf32>
    %cst_21 = arith.constant dense<0.000000e+00> : vector<8x128xf32>
    %39 = tpu.matmul %38, %6, %cst_21 {dimension_numbers = #tpu.dot_dimension_numbers<[1], [0], [0], [1], [0, 0, 1, 1], [], []>} : vector<8x256xf32>, vector<256x128xf32>, vector<8x128xf32> -> vector<8x128xf32>
    %c0_22 = arith.constant 0 : index
    %c0_23 = arith.constant 0 : index
    %40 = vector.load %arg7[%c0_22, %c0_23] : memref<1x128xf32, #tpu.memory_space<vmem>>, vector<1x128xf32>
    %41 = vector.broadcast %40 : vector<1x128xf32> to vector<8x128xf32>
    %42 = arith.addf %39, %41 : vector<8x128xf32>
    %43 = math.tanh %42 : vector<8x128xf32>
    %c0_24 = arith.constant 0 : index
    %c0_25 = arith.constant 0 : index
    %44 = vector.load %arg8[%c0_24, %c0_25] : memref<8x128xf32, #tpu.memory_space<vmem>>, vector<8x128xf32>
    tpu.vector_store %arg8[%c0_24, %c0_25], %43 {strides = array<i32>} : memref<8x128xf32, #tpu.memory_space<vmem>>, vector<8x128xf32>,
    return
  }
}

</mosaic_0001>

<bundles_post_ra>
// kernel: actor_forward.1
= control target key start
LH: loop header
LB: loop body
LE: loop exit
PB: predicated region body
PF: predicated region fallthrough
CT: control target
= control target key end

     0   :  { %13 = vsyncpa [#allocation3], 0  ;;  %s909_s0 = inlined_call_operand.hbm [shape: f32[8,32], index: 0, kind: input, shape index: {}]   ;;  %s910_s1 = inlined_call_operand.hbm [shape: bf16[32,256], index: 1, kind: input, shape index: {}]   ;;  %s911_s2 = inlined_call_operand.hbm [shape: f32[1,256], index: 2, kind: input, shape index: {}]   ;;  %s912_s3 = inlined_call_operand.vmem [shape: f32[1,256], index: 3, kind: input, shape index: {}]   ;;  %s913_s4 = inlined_call_operand.hbm [shape: bf16[256,256], index: 4, kind: input, shape index: {}]   ;;  %s914_s5 = inlined_call_operand.vmem [shape: f32[1,256], index: 5, kind: input, shape index: {}]   ;;  %s915_s6 = inlined_call_operand.hbm [shape: bf16[256,128], index: 6, kind: input, shape index: {}]   ;;  %s916_s7 = inlined_call_operand.vmem [shape: f32[1,128], index: 7, kind: input, shape index: {}]   ;;  %s917_s8 = inlined_call_operand.vmem [shape: f32[8,128], index: 8, kind: output, shape index: {}]  }
   0x1   :  { %14 = vsyncpa [#allocation5], 0  ;;  %s31_s29 = sshll.u32 %s910_s1, 4  ;;  %s32_s29 = int_to_ptr.hbm [resolvable:$true] %s31_s29 }
   0x2   :  { %15 = vsyncpa [#allocation8], 0  ;;  %s780_s30 = smov [#allocation4]   ;;  %s57_s12 = sshll.u32 %s913_s4, 4  ;;  %s58_s12 = int_to_ptr.hbm [resolvable:$true] %s57_s12 }
   0x3   :  { %s33_s9 = sshll.u32 %s780_s30, 4  ;;  %s781_s13 = smov 128   ;;  %s34_s9 = int_to_ptr.vmem [resolvable:$true] %s33_s9 }
   0x4   :  { %s782_s14 = smov 8   ;;  %s783_s15 = smov [#allocation7]  }
   0x5   :  { %39 = dma.hbm_to_vmem [thread:$0]  %s32_s29, 512, %s34_s9, [#allocation5], %s781_s13, %s781_s13, %s782_s14  }
   0x6   :  { %s59_s16 = sshll.u32 %s783_s15, 4  ;;  %s21_s19 = sshll.u32 %s909_s0, 4  ;;  %s60_s16 = int_to_ptr.vmem [resolvable:$true] %s59_s16  ;;  %s22_s19 = int_to_ptr.hbm [resolvable:$true] %s21_s19 }
   0x7   :  { %65 = dma.hbm_to_vmem [thread:$0]  %s58_s12, 4096, %s60_s16, [#allocation8], %s781_s13, %s781_s13, %s782_s14  }
   0x8   :  { %s45_s21 = sshll.u32 %s911_s2, 4  ;;  %s784_s22 = smov [#allocation2]   ;;  %s46_s21 = int_to_ptr.hbm [resolvable:$true] %s45_s21 }
   0x9   :  { %s23_s23 = sshll.u32 %s784_s22, 4  ;;  %s785_s4 = smov [#allocation6]   ;;  %s24_s23 = int_to_ptr.vmem [resolvable:$true] %s23_s23 }
   0xa   :  { %26 = dma.hbm_to_vmem [thread:$0]  %s22_s19, 128, %s24_s23, [#allocation3]  }
   0xb   :  { %s47_s24 = sshll.u32 %s785_s4, 4  ;;  %s72_s27 = sshll.u32 %s915_s6, 4  ;;  %s48_s24 = int_to_ptr.vmem [resolvable:$true] %s47_s24  ;;  %s73_s27 = int_to_ptr.hbm [resolvable:$true] %s72_s27 }
   0xc   :  { %50 = dma.hbm_to_vmem [thread:$0]  %s46_s21, 32, %s48_s24, [#allocation5]  }
   0xd   :  { %s786_s0 = smov [#allocation9]   ;;  %s787_s29 = smov 64  }
   0xe   :  { %s74_s28 = sshll.u32 %s786_s0, 4  ;;  %s788_s30 = smov 4   ;;  %s75_s28 = int_to_ptr.vmem [resolvable:$true] %s74_s28 }
   0xf   :  { %80 = dma.hbm_to_vmem [thread:$0]  %s73_s27, 2048, %s75_s28, [#allocation8], %s787_s29, %s787_s29, %s788_s30  }
  0x10   :  { %774 = dma.done.wait [#allocation3], 128  }
  0x11   :  { %775 = vsyncadd [#allocation3], 4294967168 }
  0x12   :  { %776 = dma.done.wait [#allocation5], 544  }
  0x13   :  { %777 = vsyncadd [#allocation5], 4294966752 }
  0x14   :  { %778 = dma.done.wait [#allocation8], 6144  }
  0x15   :  { %779 = vsyncadd [#allocation8], 4294961152  ;;  %v107_v0 = vld [vmem:[#allocation4 + $0x18] sm:$0xff]  ;;  %v106_v1 = vld [vmem:[#allocation4 + $0x10] sm:$0xff]  ;;  %vm276_vm0 = vcmask 261120   ;;  %v789_v13 = vmov 8.0  }
  0x16   :  { %v105_v2 = vld [vmem:[#allocation4 + $0x8] sm:$0xff]  ;;  %v114_v3 = vunpack.c.l.bf16 %v107_v0  ;;  %v115_v4 = vunpack.c.h.bf16 %v107_v0  ;;  %v112_v5 = vunpack.c.l.bf16 %v106_v1  ;;  %v113_v6 = vunpack.c.h.bf16 %v106_v1  ;;  %v104_v7 = vld [vmem:[#allocation4] sm:$0xff]  ;;  %v103_v12 = vld [vmem:[#allocation2] sm:$0xff] }
  0x17   :  { %v110_v8 = vunpack.c.l.bf16 %v105_v2  ;;  %v111_v9 = vunpack.c.h.bf16 %v105_v2  ;;  %v108_v10 = vunpack.c.l.bf16 %v104_v7  ;;  %v109_v11 = vunpack.c.h.bf16 %v104_v7  ;;  %v131_v24 = vld [vmem:[#allocation7 + $0x78] sm:$0xff]  ;;  %v130_v33 = vld [vmem:[#allocation7 + $0x70] sm:$0xff]  ;;  %v129_v41 = vld [vmem:[#allocation7 + $0x68] sm:$0xff] }
  0x18   :  { %292 = vmatpush.msra.mxu0 %v114_v3  ;;  %312 = vmatpush.msra.mxu1 %v115_v4  ;;  %646 = vrcp.f32 %v789_v13  ;;  %v147_v25 = vld [vmem:[#allocation7 + $0xf8] sm:$0xff]  ;;  %v178_v26 = vunpack.c.l.bf16 %v131_v24  ;;  %v179_v28 = vunpack.c.h.bf16 %v131_v24  ;;  %v146_v34 = vld [vmem:[#allocation7 + $0xf0] sm:$0xff]  ;;  %v176_v35 = vunpack.c.l.bf16 %v130_v33  ;;  %v145_v42 = vld [vmem:[#allocation7 + $0xe8] sm:$0xff] }
  0x19   :  { %v210_v27 = vunpack.c.l.bf16 %v147_v25  ;;  %v211_v29 = vunpack.c.h.bf16 %v147_v25  ;;  %v208_v36 = vunpack.c.l.bf16 %v146_v34  ;;  %v177_v37 = vunpack.c.h.bf16 %v130_v33  ;;  %v128_v50 = vld [vmem:[#allocation7 + $0x60] sm:$0xff]  ;;  %v127_v58 = vld [vmem:[#allocation7 + $0x58] sm:$0xff]  ;;  %v126_v2 = vld [vmem:[#allocation7 + $0x50] sm:$0xff] }
  0x1a   :  { %293 = vmatpush.msra.mxu0 %v112_v5  ;;  %313 = vmatpush.msra.mxu1 %v113_v6  ;;  %v209_v38 = vunpack.c.h.bf16 %v146_v34  ;;  %v174_v43 = vunpack.c.l.bf16 %v129_v41  ;;  %v206_v44 = vunpack.c.l.bf16 %v145_v42  ;;  %v175_v45 = vunpack.c.h.bf16 %v129_v41  ;;  %v144_v51 = vld [vmem:[#allocation7 + $0xe0] sm:$0xff]  ;;  %v143_v59 = vld [vmem:[#allocation7 + $0xd8] sm:$0xff]  ;;  %v142_v3 = vld [vmem:[#allocation7 + $0xd0] sm:$0xff] }
  0x1b   :  { %419 = vmatpush.msra.mxu2 %v178_v26  ;;  %439 = vmatpush.msra.mxu3 %v210_v27  ;;  %v207_v46 = vunpack.c.h.bf16 %v145_v42  ;;  %v172_v52 = vunpack.c.l.bf16 %v128_v50  ;;  %v204_v53 = vunpack.c.l.bf16 %v144_v51  ;;  %v173_v54 = vunpack.c.h.bf16 %v128_v50  ;;  %v139_v27 = vld [vmem:[#allocation7 + $0xb8] sm:$0xff]  ;;  %v121_v34 = vld [vmem:[#allocation7 + $0x28] sm:$0xff] }
  0x1c   :  { %294 = vmatpush.msra.mxu0 %v110_v8  ;;  %314 = vmatpush.msra.mxu1 %v111_v9  ;;  %v205_v55 = vunpack.c.h.bf16 %v144_v51  ;;  %v170_v60 = vunpack.c.l.bf16 %v127_v58  ;;  %v202_v61 = vunpack.c.l.bf16 %v143_v59  ;;  %v171_v62 = vunpack.c.h.bf16 %v127_v58 }
  0x1d   :  { %420 = vmatpush.msra.mxu2 %v176_v35  ;;  %440 = vmatpush.msra.mxu3 %v208_v36  ;;  %v203_v63 = vunpack.c.h.bf16 %v143_v59  ;;  %v168_v4 = vunpack.c.l.bf16 %v126_v2  ;;  %v200_v5 = vunpack.c.l.bf16 %v142_v3  ;;  %v169_v6 = vunpack.c.h.bf16 %v126_v2  ;;  %v137_v35 = vld [vmem:[#allocation7 + $0xa8] sm:$0xff] }
  0x1e   :  { %295 = vmatpush.msra.mxu0 %v108_v10  ;;  %315 = vmatpush.msra.mxu1 %v109_v11  ;;  %v647_v14 = vpop.eup %646  ;;  %v201_v7 = vunpack.c.h.bf16 %v142_v3  ;;  %v125_v10 = vld [vmem:[#allocation7 + $0x48] sm:$0xff]  ;;  %v194_v33 = vunpack.c.l.bf16 %v139_v27  ;;  %v159_v51 = vunpack.c.h.bf16 %v121_v34  ;;  %vm385_vm8 = vcmask 1040384  }
  0x1f   :  { %554 = vmatmul.msk.f32.vlgmr.msra.gmra.mxu0 %vm276_vm0, %v103_v12  ;;  %555 = vmatmul.msk.f32.vlgmr.msra.gmra.mxu1 %vm276_vm0, %v103_v12  ;;  %v333_v15 = vmul.f32 8.0, %v647_v14  ;;  %vm337_vm1 = vweird.f32 %v647_v14  ;;  %v141_v11 = vld [vmem:[#allocation7 + $0xc8] sm:$0xff]  ;;  %v166_v12 = vunpack.c.l.bf16 %v125_v10 }
  0x20   :  { %459 = vmatpush.msrb.mxu0 %v179_v28  ;;  %479 = vmatpush.msrb.mxu1 %v211_v29  ;;  %v198_v13 = vunpack.c.l.bf16 %v141_v11  ;;  %v122_v28 = vld [vmem:[#allocation7 + $0x30] sm:$0xff] }
  0x21   :  { %v334_v16 = vsub.f32 1.0, %v333_v15  ;;  %421 = vmatpush.msra.mxu2 %v174_v43  ;;  %441 = vmatpush.msra.mxu3 %v206_v44  ;;  %v199_v15 = vunpack.c.h.bf16 %v141_v11  ;;  %v138_v29 = vld [vmem:[#allocation7 + $0xb0] sm:$0xff]  ;;  %v161_v42 = vunpack.c.h.bf16 %v122_v28  ;;  %v120_v44 = vld [vmem:[#allocation7 + $0x20] sm:$0xff] }
  0x22   :  { %460 = vmatpush.msrb.mxu0 %v177_v37  ;;  %480 = vmatpush.msrb.mxu1 %v209_v38  ;;  %v195_v37 = vunpack.c.h.bf16 %v139_v27  ;;  %v160_v38 = vunpack.c.l.bf16 %v122_v28  ;;  %v193_v43 = vunpack.c.h.bf16 %v138_v29  ;;  %v157_v59 = vunpack.c.h.bf16 %v120_v44 }
  0x23   :  { %v335_v20 = vmul.f32 %v647_v14, %v334_v16  ;;  %422 = vmatpush.msra.mxu2 %v172_v52  ;;  %442 = vmatpush.msra.mxu3 %v204_v53  ;;  %v191_v52 = vunpack.c.h.bf16 %v137_v35  ;;  %v119_v53 = vld [vmem:[#allocation7 + $0x18] sm:$0xff] }
  0x24   :  { %461 = vmatpush.msrb.mxu0 %v175_v45  ;;  %481 = vmatpush.msrb.mxu1 %v207_v46  ;;  %v136_v45 = vld [vmem:[#allocation7 + $0xa0] sm:$0xff]  ;;  %v158_v46 = vunpack.c.l.bf16 %v121_v34 }
  0x25   :  { %v336_v31 = vadd.f32 %v647_v14, %v335_v20  ;;  %423 = vmatpush.msra.mxu2 %v170_v60  ;;  %443 = vmatpush.msra.mxu3 %v202_v61  ;;  %v124_v20 = vld [vmem:[#allocation7 + $0x40] sm:$0xff]  ;;  %v189_v60 = vunpack.c.h.bf16 %v136_v45  ;;  %v118_v61 = vld [vmem:[#allocation7 + $0x10] sm:$0xff] }
  0x26   :  { %462 = vmatpush.msrb.mxu0 %v173_v54  ;;  %482 = vmatpush.msrb.mxu1 %v205_v55  ;;  %v165_v25 = vunpack.c.h.bf16 %v124_v20  ;;  %v135_v54 = vld [vmem:[#allocation7 + $0x98] sm:$0xff]  ;;  %v156_v55 = vunpack.c.l.bf16 %v120_v44  ;;  %v624_v44 = vld [vmem:[#allocation9 + $0x28] sm:$0xff]  }
  0x27   :  { %v859_v48 = vsel %vm337_vm1, %v647_v14, %v336_v31  ;;  %424 = vmatpush.msra.mxu2 %v168_v4  ;;  %444 = vmatpush.msra.mxu3 %v200_v5  ;;  %v167_v14 = vunpack.c.h.bf16 %v125_v10  ;;  %v186_v2 = vunpack.c.l.bf16 %v135_v54  ;;  %v155_v5 = vunpack.c.h.bf16 %v119_v53 }
  0x28   :  { %463 = vmatpush.msrb.mxu0 %v171_v62  ;;  %483 = vmatpush.msrb.mxu1 %v203_v63  ;;  %v134_v62 = vld [vmem:[#allocation7 + $0x90] sm:$0xff]  ;;  %v154_v63 = vunpack.c.l.bf16 %v119_v53 }
  0x29   :  { %425 = vmatpush.msra.mxu2 %v166_v12  ;;  %445 = vmatpush.msra.mxu3 %v198_v13  ;;  %v184_v10 = vunpack.c.l.bf16 %v134_v62  ;;  %v153_v13 = vunpack.c.h.bf16 %v118_v61 }
  0x2a   :  { %464 = vmatpush.msrb.mxu0 %v169_v6  ;;  %484 = vmatpush.msrb.mxu1 %v201_v7  ;;  %v187_v6 = vunpack.c.h.bf16 %v135_v54  ;;  %v117_v7 = vld [vmem:[#allocation7 + $0x8] sm:$0xff]  ;;  %v631_v54 = vld [vmem:[#allocation9 + $0x60] sm:$0xff]  }
  0x2c   :  { %465 = vmatpush.msrb.mxu0 %v167_v14  ;;  %485 = vmatpush.msrb.mxu1 %v199_v15  ;;  %v185_v14 = vunpack.c.h.bf16 %v134_v62  ;;  %v116_v15 = vld [vmem:[#allocation7] sm:$0xff] }
  0x2e   :  { %466 = vmatpush.msrb.mxu0 %v165_v25  ;;  %v148_v25 = vunpack.c.l.bf16 %v116_v15 }
  0x9c   :  { %v850_v17 = vpop.f32.mrf.mxu0  ;;  %v852_v18 = vpop.f32.mrf.mxu1 }
  0x9d   :  { %v320_v19 = vrot.slane %v850_v17, 4  ;;  %v326_v21 = vrot.slane %v852_v18, 4 }
  0x9f   :  { %v321_v22 = vadd.f32 %v320_v19, %v850_v17  ;;  %v327_v23 = vadd.f32 %v326_v21, %v852_v18  ;;  %v140_v21 = vld [vmem:[#allocation7 + $0xc0] sm:$0xff] }
  0xa0   :  { %v196_v24 = vunpack.c.l.bf16 %v140_v21  ;;  %v197_v26 = vunpack.c.h.bf16 %v140_v21 }
  0xa1   :  { %v322_v30 = vrot.slane %v321_v22, 2  ;;  %v328_v32 = vrot.slane %v327_v23, 2 }
  0xa2   :  { %446 = vmatpush.msra.mxu3 %v196_v24  ;;  %486 = vmatpush.msrb.mxu1 %v197_v26 }
  0xa3   :  { %v323_v39 = vadd.f32 %v322_v30, %v321_v22  ;;  %v329_v40 = vadd.f32 %v328_v32, %v327_v23  ;;  %v123_v22 = vld [vmem:[#allocation7 + $0x38] sm:$0xff]  ;;  %v164_v23 = vunpack.c.l.bf16 %v124_v20 }
  0xa4   :  { %v162_v32 = vunpack.c.l.bf16 %v123_v22  ;;  %v163_v36 = vunpack.c.h.bf16 %v123_v22  ;;  %447 = vmatpush.msra.mxu3 %v194_v33  ;;  %487 = vmatpush.msrb.mxu1 %v195_v37 }
  0xa5   :  { %v324_v47 = vrot.slane %v323_v39, 1  ;;  %v330_v49 = vrot.slane %v329_v40, 1  ;;  %426 = vmatpush.msra.mxu2 %v164_v23  ;;  %v151_v23 = vunpack.c.h.bf16 %v117_v7 }
  0xa6   :  { %467 = vmatpush.msrb.mxu0 %v163_v36  ;;  %488 = vmatpush.msrb.mxu1 %v193_v43  ;;  %v625_v36 = vld [vmem:[#allocation9 + $0x30] sm:$0xff]   ;;  %v632_v43 = vld [vmem:[#allocation9 + $0x68] sm:$0xff]  }
  0xa7   :  { %v325_v56 = vadd.f32 %v324_v47, %v323_v39  ;;  %v331_v57 = vadd.f32 %v330_v49, %v329_v40  ;;  %v192_v39 = vunpack.c.l.bf16 %v138_v29  ;;  %427 = vmatpush.msra.mxu2 %v162_v32  ;;  %v190_v47 = vunpack.c.l.bf16 %v137_v35  ;;  %v626_v32 = vld [vmem:[#allocation9 + $0x38] sm:$0xff]  }
  0xa8   :  { %468 = vmatpush.msrb.mxu0 %v161_v42  ;;  %489 = vmatpush.msrb.mxu1 %v191_v52  ;;  %v149_v29 = vunpack.c.h.bf16 %v116_v15  ;;  %v587_v35 = vunpack.c.h.bf16 %v626_v32  ;;  %v586_v37 = vunpack.c.l.bf16 %v626_v32  ;;  %v579_v52 = vunpack.c.h.bf16 %v624_v44 }
  0xa9   :  { %v862_v0 = vmul.f32 %v859_v48, %v325_v56  ;;  %v865_v1 = vmul.f32 %v859_v48, %v331_v57  ;;  %428 = vmatpush.msra.mxu2 %v160_v38  ;;  %448 = vmatpush.msra.mxu3 %v192_v39  ;;  %v188_v56 = vunpack.c.l.bf16 %v136_v45 }
  0xaa   :  { %469 = vmatpush.msrb.mxu0 %v159_v51  ;;  %490 = vmatpush.msrb.mxu1 %v189_v60  ;;  %v611_v51 = vunpack.c.h.bf16 %v632_v43 }
  0xab   :  { %v341_v8 = vsub.f32 %v850_v17, %v862_v0  ;;  %v342_v9 = vsub.f32 %v852_v18, %v865_v1  ;;  %429 = vmatpush.msra.mxu2 %v158_v46  ;;  %449 = vmatpush.msra.mxu3 %v190_v47  ;;  %v582_v47 = vunpack.c.l.bf16 %v625_v36 }
  0xac   :  { %470 = vmatpush.msrb.mxu0 %v157_v59  ;;  %491 = vmatpush.msrb.mxu1 %v187_v6 }
  0xad   :  { %v343_v16 = vmul.f32 %v341_v8, %v341_v8  ;;  %v344_v19 = vmul.f32 %v342_v9, %v342_v9  ;;  %v133_v8 = vld [vmem:[#allocation7 + $0x88] sm:$0xff]  ;;  %430 = vmatpush.msra.mxu2 %v156_v55  ;;  %450 = vmatpush.msra.mxu3 %v188_v56  ;;  %v152_v9 = vunpack.c.l.bf16 %v118_v61  ;;  %v623_v55 = vld [vmem:[#allocation9 + $0x20] sm:$0xff]   ;;  %v607_v61 = vunpack.c.h.bf16 %v631_v54 }
  0xae   :  { %v182_v20 = vunpack.c.l.bf16 %v133_v8  ;;  %471 = vmatpush.msrb.mxu0 %v155_v5  ;;  %v183_v24 = vunpack.c.h.bf16 %v133_v8  ;;  %492 = vmatpush.msrb.mxu1 %v185_v14  ;;  %v575_v62 = vunpack.c.h.bf16 %v623_v55  ;;  %v606_v5 = vunpack.c.l.bf16 %v631_v54 }
  0xaf   :  { %v345_v30 = vrot.slane %v343_v16, 4  ;;  %v351_v31 = vrot.slane %v344_v19, 4  ;;  %431 = vmatpush.msra.mxu2 %v154_v63  ;;  %451 = vmatpush.msra.mxu3 %v186_v2  ;;  %v630_v63 = vld [vmem:[#allocation9 + $0x58] sm:$0xff]   ;;  %v574_v6 = vunpack.c.l.bf16 %v623_v55 }
  0xb0   :  { %472 = vmatpush.msrb.mxu0 %v153_v13  ;;  %493 = vmatpush.msrb.mxu1 %v183_v24  ;;  %v622_v2 = vld [vmem:[#allocation9 + $0x18] sm:$0xff]   ;;  %v603_v8 = vunpack.c.h.bf16 %v630_v63  ;;  %v629_v13 = vld [vmem:[#allocation9 + $0x50] sm:$0xff]   ;;  %v602_v15 = vunpack.c.l.bf16 %v630_v63 }
  0xb1   :  { %v346_v40 = vadd.f32 %v345_v30, %v343_v16  ;;  %v352_v41 = vadd.f32 %v351_v31, %v344_v19  ;;  %v132_v16 = vld [vmem:[#allocation7 + $0x80] sm:$0xff]  ;;  %v150_v19 = vunpack.c.l.bf16 %v117_v7  ;;  %432 = vmatpush.msra.mxu2 %v152_v9  ;;  %452 = vmatpush.msra.mxu3 %v184_v10  ;;  %v633_v31 = vld [vmem:[#allocation9 + $0x70] sm:$0xff]   ;;  %v571_v9 = vunpack.c.h.bf16 %v622_v2 }
  0xb2   :  { %v180_v26 = vunpack.c.l.bf16 %v132_v16  ;;  %v181_v30 = vunpack.c.h.bf16 %v132_v16  ;;  %473 = vmatpush.msrb.mxu0 %v151_v23  ;;  %v615_v39 = vunpack.c.h.bf16 %v633_v31  ;;  %v614_v46 = vunpack.c.l.bf16 %v633_v31 }
  0xb3   :  { %v347_v49 = vrot.slane %v346_v40, 2  ;;  %v353_v50 = vrot.slane %v352_v41, 2  ;;  %433 = vmatpush.msra.mxu2 %v150_v19  ;;  %453 = vmatpush.msra.mxu3 %v182_v20  ;;  %v392_v10 = vrot.slane %v865_v1, 7  ;;  %v599_v20 = vunpack.c.h.bf16 %v629_v13  ;;  %v389_v1 = vld [vmem:[%s912_s3] sm:$0x3] }
  0xb4   :  { %474 = vmatpush.msrb.mxu0 %v149_v29  ;;  %494 = vmatpush.msrb.mxu1 %v181_v30 }
  0xb5   :  { %v348_v57 = vadd.f32 %v347_v49, %v346_v40  ;;  %v354_v58 = vadd.f32 %v353_v50, %v352_v41  ;;  %434 = vmatpush.msra.mxu2 %v148_v25  ;;  %454 = vmatpush.msra.mxu3 %v180_v26  ;;  %v583_v40 = vunpack.c.h.bf16 %v625_v36  ;;  %v598_v25 = vunpack.c.l.bf16 %v629_v13  ;;  %v621_v36 = vld [vmem:[#allocation9 + $0x10] sm:$0xff]  }
  0xb7   :  { %v349_v3 = vrot.slane %v348_v57, 1  ;;  %v355_v4 = vrot.slane %v354_v58, 1  ;;  %505 = vmatpush.msrb.mxu2 %v587_v35 }
  0xb9   :  { %v350_v11 = vadd.f32 %v349_v3, %v348_v57  ;;  %v356_v12 = vadd.f32 %v355_v4, %v354_v58  ;;  %506 = vmatpush.msrb.mxu2 %v586_v37  ;;  %v610_v57 = vunpack.c.l.bf16 %v632_v43  ;;  %v578_v58 = vunpack.c.l.bf16 %v624_v44  ;;  %v557_v44 = vld [vmem:[#allocation9] sm:$0xff]  }
  0xbb   :  { %v357_v21 = vmul.f32 %v350_v11, %v859_v48  ;;  %v358_v22 = vmul.f32 %v356_v12, %v859_v48  ;;  %v634_v48 = vld [vmem:[#allocation9 + $0x78] sm:$0xff]   ;;  %507 = vmatpush.msrb.mxu2 %v583_v40  ;;  %v620_v40 = vld [vmem:[#allocation9 + $0x8] sm:$0xff]  }
  0xbc   :  { %v619_v33 = vunpack.c.h.bf16 %v634_v48  ;;  %v618_v34 = vunpack.c.l.bf16 %v634_v48  ;;  %v359_v11 = vld [vmem:[#allocation6] sm:$0x3]  ;;  %v562_v43 = vunpack.c.l.bf16 %v620_v40 }
  0xbd   :  { %v873_v27 = vadd.f32 1e-05, %v357_v21  ;;  %v875_v28 = vadd.f32 1e-05, %v358_v22  ;;  %508 = vmatpush.msrb.mxu2 %v582_v47  ;;  %v393_v21 = vsel %vm385_vm8, %v862_v0, %v392_v10  ;;  %v628_v0 = vld [vmem:[#allocation9 + $0x48] sm:$0xff]  }
  0xbe   :  { %525 = vmatpush.msrb.mxu3 %v619_v33  ;;  %v595_v35 = vunpack.c.h.bf16 %v628_v0  ;;  %v594_v37 = vunpack.c.l.bf16 %v628_v0  ;;  %v413_v47 = vld [vmem:[%s914_s5] sm:$0x3] }
  0xbf   :  { %648 = vrsqrt.f32 %v873_v27  ;;  %509 = vmatpush.msrb.mxu2 %v579_v52  ;;  %vm378_vm3 = vweird.f32 %v875_v28  ;;  %vm368_vm6 = vweird.f32 %v873_v27 }
  0xc0   :  { %650 = vrsqrt.f32 %v875_v28  ;;  %526 = vmatpush.msrb.mxu3 %v618_v34  ;;  %v570_v34 = vunpack.c.l.bf16 %v622_v2 }
  0xc1   :  { %510 = vmatpush.msrb.mxu2 %v578_v58 }
  0xc2   :  { %527 = vmatpush.msrb.mxu3 %v615_v39 }
  0xc3   :  { %511 = vmatpush.msrb.mxu2 %v575_v62 }
  0xc4   :  { %528 = vmatpush.msrb.mxu3 %v614_v46  ;;  %v558_v46 = vunpack.c.l.bf16 %v557_v44 }
  0xc5   :  { %v879_v38 = vpop.eup %648  ;;  %512 = vmatpush.msrb.mxu2 %v574_v6 }
  0xc6   :  { %v651_v41 = vpop.eup %650  ;;  %v363_v42 = vmul.f32 %v879_v38, %v873_v27  ;;  %529 = vmatpush.msrb.mxu3 %v611_v51  ;;  %vm369_vm4 = vweird.f32 %v879_v38 }
  0xc7   :  { %v373_v45 = vmul.f32 %v651_v41, %v875_v28  ;;  %vm379_vm2 = vweird.f32 %v651_v41  ;;  %vm370_vm7 = vmor %vm368_vm6, %vm369_vm4  ;;  %513 = vmatpush.msrb.mxu2 %v571_v9 }
  0xc8   :  { %v364_v49 = vmul.f32 %v879_v38, %v363_v42  ;;  %530 = vmatpush.msrb.mxu3 %v610_v57  ;;  %vm380_vm5 = vmor %vm378_vm3, %vm379_vm2 }
  0xc9   :  { %v374_v50 = vmul.f32 %v651_v41, %v373_v45  ;;  %514 = vmatpush.msrb.mxu2 %v570_v34  ;;  %v559_v45 = vunpack.c.h.bf16 %v557_v44 }
  0xca   :  { %v365_v53 = vmul.f32 0.5, %v364_v49  ;;  %531 = vmatpush.msrb.mxu3 %v607_v61  ;;  %v416_v49 = vperm.slane %v413_v47, 1  ;;  %v645_v61 = vld [vmem:[%s916_s7] ss:$0 sm:$0xff] }
  0xcb   :  { %v375_v56 = vmul.f32 0.5, %v374_v50 }
  0xcc   :  { %v366_v59 = vsub.f32 1.5, %v365_v53  ;;  %532 = vmatpush.msrb.mxu3 %v606_v5  ;;  %v415_v53 = vperm.slane %v413_v47, 0 }
  0xcd   :  { %v376_v60 = vsub.f32 1.5, %v375_v56 }
  0xce   :  { %v367_v3 = vmul.f32 %v879_v38, %v366_v59  ;;  %533 = vmatpush.msrb.mxu3 %v603_v8 }
  0xcf   :  { %v377_v4 = vmul.f32 %v651_v41, %v376_v60 }
  0xd0   :  { %v371_v14 = vsel %vm370_vm7, %v879_v38, %v367_v3  ;;  %534 = vmatpush.msrb.mxu3 %v602_v15  ;;  %v627_v38 = vld [vmem:[#allocation9 + $0x40] sm:$0xff]  }
  0xd1   :  { %v381_v7 = vsel %vm380_vm5, %v651_v41, %v377_v4  ;;  %v591_v39 = vunpack.c.h.bf16 %v627_v38  ;;  %v563_v41 = vunpack.c.h.bf16 %v620_v40  ;;  %v590_v42 = vunpack.c.l.bf16 %v627_v38 }
  0xd2   :  { %v384_v12 = vrot.slane %v381_v7, 7  ;;  %535 = vmatpush.msrb.mxu3 %v599_v20 }
  0xd4   :  { %v386_v16 = vsel %vm385_vm8, %v371_v14, %v384_v12  ;;  %536 = vmatpush.msrb.mxu3 %v598_v25 }
  0xd5   :  { %v388_v19 = vmul.f32 %v386_v16, %v359_v11 }
  0xd6   :  { %537 = vmatpush.msrb.mxu3 %v595_v35 }
  0xd7   :  { %v395_v22 = vmul.f32 %v393_v21, %v388_v19  ;;  %v398_v23 = vperm.slane %v388_v19, 0  ;;  %v399_v24 = vperm.slane %v388_v19, 1 }
  0xd8   :  { %538 = vmatpush.msrb.mxu3 %v594_v37 }
  0xd9   :  { %v396_v26 = vsub.f32 %v389_v1, %v395_v22  ;;  %v402_v27 = vmul.f32 %v398_v23, %v850_v17  ;;  %v403_v29 = vmul.f32 %v399_v24, %v852_v18  ;;  %v567_v17 = vunpack.c.h.bf16 %v621_v36 }
  0xda   :  { %v566_v18 = vunpack.c.l.bf16 %v621_v36  ;;  %539 = vmatpush.msrb.mxu3 %v591_v39 }
  0xdb   :  { %v405_v28 = vperm.slane %v396_v26, 0  ;;  %v406_v30 = vperm.slane %v396_v26, 1  ;;  %515 = vmatpush.msrb.mxu2 %v567_v17 }
  0xdc   :  { %540 = vmatpush.msrb.mxu3 %v590_v42 }
  0xdd   :  { %v409_v48 = vadd.f32 %v405_v28, %v402_v27  ;;  %v410_v31 = vadd.f32 %v406_v30, %v403_v29  ;;  %516 = vmatpush.msrb.mxu2 %v566_v18 }
  0xdf   :  { %v411_v32 = vmax.f32 %v409_v48, 0.0  ;;  %v412_v33 = vmax.f32 %v410_v31, 0.0  ;;  %517 = vmatpush.msrb.mxu2 %v563_v41 }
  0xe1   :  { %435 = vmatmul.f32.vlgmr.msra.gmra.mxu2 %v411_v32  ;;  %455 = vmatmul.f32.vlgmr.msra.gmra.mxu3 %v412_v33 }
  0xe2   :  { %475 = vmatmul.f32.vlgmr.msrb.gmra.mxu0 %v411_v32  ;;  %495 = vmatmul.f32.vlgmr.msrb.gmra.mxu1 %v412_v33 }
  0xe3   :  { %518 = vmatpush.msrb.mxu2 %v562_v43 }
  0xe5   :  { %519 = vmatpush.msrb.mxu2 %v559_v45 }
  0xe7   :  { %520 = vmatpush.msrb.mxu2 %v558_v46 }
 0x15f   :  { %v476_v50 = vpop.f32.mrf.mxu0  ;;  %v496_v52 = vpop.f32.mrf.mxu1 }
 0x160   :  { %v477_v51 = vadd.f32 %v476_v50, %v416_v49 }
 0x162   :  { %v497_v54 = vadd.f32 %v496_v52, %v477_v51 }
 0x164   :  { %v500_v55 = vmax.f32 %v497_v54, 0.0  ;;  %v436_v56 = vpop.f32.mrf.mxu2  ;;  %v456_v58 = vpop.f32.mrf.mxu3 }
 0x165   :  { %v437_v57 = vadd.f32 %v436_v56, %v415_v53 }
 0x166   :  { %541 = vmatmul.f32.vlgmr.msrb.gmra.mxu3 %v500_v55 }
 0x167   :  { %v457_v59 = vadd.f32 %v456_v58, %v437_v57 }
 0x169   :  { %v499_v60 = vmax.f32 %v457_v59, 0.0 }
 0x16b   :  { %521 = vmatmul.f32.vlgmr.msrb.gmra.mxu2 %v499_v60 }
 0x1e9   :  { %v542_v2 = vpop.f32.mrf.mxu3 }
 0x1ee   :  { %v522_v62 = vpop.f32.mrf.mxu2 }
 0x1ef   :  { %v523_v63 = vadd.f32 %v645_v61, %v522_v62 }
 0x1f1   :  { %v543_v3 = vadd.f32 %v542_v2, %v523_v63 }
 0x1f3   :  { %652 = vtanh.f32 %v543_v3 }
 0x1f9   :  { %v653_v4 = vpop.eup %652 }
 0x1fa   :  { %546 = vst [vmem:[%s917_s8] sm:$0xff] %v653_v4 }
 0x1fb   :  { %551 = vsyncpa [#allocation3], 1 }
 0x1fc   :  { %552 = vsyncpa [#allocation5], 1 }
 0x1fd   :  { %553 = vsyncpa [#allocation8], 1 }

</bundles_post_ra>
